<compile_context>
chip_gen: v6e
topology: v6e:2x2x1
jax: 0.10.0
libtpu: 0.0.40
codegen_flags: <defaults>
</compile_context>

<pallas_src>
import jax
import jax.numpy as jnp
import numpy as np
from jax.experimental import pallas as pl
from jax.experimental.pallas import tpu as pltpu


def _round_up(x, m):
    return ((x + m - 1) // m) * m


def _pad_feature(d):
    """Pad a feature dim to 128; bump to 256 if the extra padding is <=30%."""
    p = _round_up(d, 128)
    p256 = _round_up(d, 256)
    if p256 != p and (p256 - d) <= 0.3 * d:
        return p256
    return p


def _pad_to(x, shape):
    pads = [(0, t - s) for s, t in zip(x.shape, shape)]
    if all(p == (0, 0) for p in pads):
        return x
    return jnp.pad(x, pads)


def _sigmoid(z):
    # sigmoid(z) == 0.5 * tanh(0.5 * z) + 0.5  -> single EUP op per element.
    return 0.5 * jnp.tanh(0.5 * z) + 0.5


def supnet_kernel(x_ref, w_ref, b1_ref, b2_ref, o_ref):
    # x_ref : (TB,     D_in_p)  VMEM, streamed / double-buffered batch tile
    # w_ref : (D_in_p, D_lat_p) VMEM, resident (single-buffered) RBM weight
    # b1_ref: (1, D_lat_p)      VMEM, hidden bias  (f32)
    # b2_ref: (1, D_in_p)       VMEM, visible bias (f32)
    # o_ref : (TB,     D_in_p)  VMEM, output tile
    w = w_ref[...]
    x = x_ref[...].astype(w.dtype)          # cast on the tile, not in the wrapper

    # linear1: x @ W + b_hidden, f32 MXU accumulation, f32 sigmoid.
    h = jax.lax.dot_general(
        x, w, dimension_numbers=(((1,), (0,)), ((), ())),
        preferred_element_type=jnp.float32)
    h = _sigmoid(h + b1_ref[...])

    # linear2: h @ W.T as a (1,1)-contraction -> no XLU transpose of W.
    h = h.astype(w.dtype)
    y = jax.lax.dot_general(
        h, w, dimension_numbers=(((1,), (1,)), ((), ())),
        preferred_element_type=jnp.float32)
    y = _sigmoid(y + b2_ref[...])

    o_ref[...] = y.astype(o_ref.dtype)


def supervised_network_forward(state, rbm_weights, hidden_bias, visible_bias,
                               *, block_b=512, matmul_dtype=jnp.bfloat16,
                               out_dtype=jnp.float32):
    """state: (B, D_in); rbm_weights: (D_in, D_lat); biases 1-D.

    matmul_dtype: MXU operand dtype (bf16 is native at peak on v5e/v6e/v7x;
    accumulation and the sigmoids are always f32).
    out_dtype: output dtype (use bf16 when the consumer tolerates it to halve
    HBM writeback).
    """
    B, D_in = state.shape
    D_lat = rbm_weights.shape[1]

    # Lane-dense padded feature dims.
    D_in_p = _pad_feature(D_in)
    D_lat_p = _pad_feature(D_lat)

    # Batch tiling: minimize padding, and give the "parallel" grid axis at
    # least 2 tiles (v7x has 2 TensorCores) whenever B is big enough to split.
    n_tiles = max(pl.cdiv(B, block_b), 2 if B > 8 else 1)
    tb = _round_up(pl.cdiv(B, n_tiles), 8)
    B_p = _round_up(B, tb)
    grid = (B_p // tb,)

    # x keeps the caller's dtype (cast happens in-kernel); pad only if needed,
    # so an already-aligned x incurs zero extra HBM traffic before the kernel.
    x_p = _pad_to(state, (B_p, D_in_p))
    # W is cast once in the wrapper so its resident VMEM copy is matmul_dtype.
    w_p = _pad_to(rbm_weights, (D_in_p, D_lat_p)).astype(matmul_dtype)
    # Biases stay f32 (added to the f32 accumulators); zero-padded (exactness
    # of the padding scheme relies on the pads being exactly zero).
    b1_p = _pad_to(hidden_bias.astype(jnp.float32).reshape(1, D_lat), (1, D_lat_p))
    b2_p = _pad_to(visible_bias.astype(jnp.float32).reshape(1, D_in), (1, D_in_p))

    mm_bytes = jnp.dtype(matmul_dtype).itemsize
    x_bytes = jnp.dtype(x_p.dtype).itemsize
    out_bytes = jnp.dtype(out_dtype).itemsize

    # VMEM budget: 2x x-tile + 1x W + biases + 2x out-tile + f32 h/y
    # intermediates + in-kernel casted copies; 2x headroom, capped at 48 MiB
    # (never request all of v7x's 64 MiB physical VMEM).
    vmem_needed = (
        2 * tb * D_in_p * x_bytes
        + D_in_p * D_lat_p * mm_bytes
        + (D_lat_p + D_in_p) * 4
        + 2 * tb * D_in_p * out_bytes
        + tb * (D_lat_p + D_in_p) * 4
        + tb * (D_in_p + D_lat_p) * mm_bytes
    )
    vmem_limit = int(min(max(2 * vmem_needed, 16 << 20), 48 << 20))

    cost = pl.CostEstimate(
        flops=2 * 2 * B_p * D_in_p * D_lat_p,              # two matmuls
        transcendentals=B_p * (D_lat_p + D_in_p),          # one tanh per element
        bytes_accessed=(B_p * D_in_p * x_bytes             # x in
                        + D_in_p * D_lat_p * mm_bytes      # W
                        + (D_lat_p + D_in_p) * 4           # biases
                        + B_p * D_in_p * out_bytes),       # out
    )

    out_p = pl.pallas_call(
        supnet_kernel,
        out_shape=jax.ShapeDtypeStruct((B_p, D_in_p), out_dtype),
        grid_spec=pltpu.PrefetchScalarGridSpec(
            num_scalar_prefetch=0,
            grid=grid,
            in_specs=[
                # x: streamed / double-buffered batch tile.
                pl.BlockSpec((tb, D_in_p), lambda i: (i, 0)),
                # W and biases: grid-invariant -> single pipeline buffer.
                pl.BlockSpec((D_in_p, D_lat_p), lambda i: (0, 0),
                             pipeline_mode=pl.Buffered(1)),
                pl.BlockSpec((1, D_lat_p), lambda i: (0, 0),
                             pipeline_mode=pl.Buffered(1)),
                pl.BlockSpec((1, D_in_p), lambda i: (0, 0),
                             pipeline_mode=pl.Buffered(1)),
            ],
            out_specs=pl.BlockSpec((tb, D_in_p), lambda i: (i, 0)),
        ),
        compiler_params=pltpu.CompilerParams(
            dimension_semantics=("parallel",),   # batch tiles -> both TCs on v7x
            vmem_limit_bytes=vmem_limit,
        ),
        cost_estimate=cost,
    )(x_p, w_p, b1_p, b2_p)

    if (B_p, D_in_p) != (B, D_in):
        out_p = out_p[:B, :D_in]
    return out_p


def reference_forward(state, rbm_weights, hidden_bias, visible_bias):
    h = jax.nn.sigmoid(state @ rbm_weights + hidden_bias[None, :])
    return jax.nn.sigmoid(h @ rbm_weights.T + visible_bias[None, :])


if __name__ == "__main__":
    # Small shapes implied by the module: (batch, input_dim) state, RBM with
    # input_dim visible units and latent_dim hidden units.
    B, D_in, D_lat = 8, 64, 32

    key = jax.random.PRNGKey(0)
    k_w, k_hb, k_vb, k_x = jax.random.split(key, 4)

    rbm_weights = jax.random.normal(k_w, (D_in, D_lat), dtype=jnp.float32) * 0.1
    hidden_bias = jax.random.normal(k_hb, (D_lat,), dtype=jnp.float32) * 0.1
    visible_bias = jax.random.normal(k_vb, (D_in,), dtype=jnp.float32) * 0.1
    state = jax.random.uniform(k_x, (B, D_in), dtype=jnp.float32)

    ref = reference_forward(state, rbm_weights, hidden_bias, visible_bias)

    # f32 MXU operands: exact matmul path; tolerance loosened slightly because
    # the in-kernel sigmoid uses the single-EUP tanh formulation.
    out_f32 = supervised_network_forward(
        state, rbm_weights, hidden_bias, visible_bias,
        matmul_dtype=jnp.float32)
    out_f32 = jax.block_until_ready(out_f32)
    np.testing.assert_allclose(np.asarray(out_f32), np.asarray(ref),
                               rtol=5e-4, atol=5e-4)

    # Default fast path: bf16 MXU operands, f32 accumulation + sigmoids.
    out_bf16 = supervised_network_forward(
        state, rbm_weights, hidden_bias, visible_bias)
    out_bf16 = jax.block_until_ready(out_bf16)
    np.testing.assert_allclose(np.asarray(out_bf16), np.asarray(ref),
                               rtol=2e-2, atol=2e-2)

    print("KERNEL_OK")
</pallas_src>

<mosaic_0001>
module attributes {stable_mosaic.version = 11 : i64} {
  func.func @supnet_kernel(%arg0: i32, %arg1: memref<8x128xf32, #tpu.memory_space<vmem>>, %arg2: memref<128x128xf32, #tpu.memory_space<vmem>>, %arg3: memref<1x128xf32, #tpu.memory_space<vmem>>, %arg4: memref<1x128xf32, #tpu.memory_space<vmem>>, %arg5: memref<8x128xf32, #tpu.memory_space<vmem>>) attributes {dimension_semantics = [#tpu.dimension_semantics<parallel>], iteration_bounds = array<i64: 1>, scalar_prefetch = 0 : i64, scratch_operands = 0 : i64, tpu.core_type = #tpu.core_type<tc>, window_params = [{transform_indices = @transform_0, window_bounds = array<i64: 8, 128>}, {pipeline_mode = #tpu.pipeline_mode<synchronous>, transform_indices = @transform_1, window_bounds = array<i64: 128, 128>}, {pipeline_mode = #tpu.pipeline_mode<synchronous>, transform_indices = @transform_2, window_bounds = array<i64: 1, 128>}, {pipeline_mode = #tpu.pipeline_mode<synchronous>, transform_indices = @transform_3, window_bounds = array<i64: 1, 128>}, {transform_indices = @transform_4, window_bounds = array<i64: 8, 128>}]} {
    %c0 = arith.constant 0 : index
    %c0_0 = arith.constant 0 : index
    %0 = vector.load %arg2[%c0, %c0_0] : memref<128x128xf32, #tpu.memory_space<vmem>>, vector<128x128xf32>
    %c0_1 = arith.constant 0 : index
    %c0_2 = arith.constant 0 : index
    %1 = vector.load %arg1[%c0_1, %c0_2] : memref<8x128xf32, #tpu.memory_space<vmem>>, vector<8x128xf32>
    %cst = arith.constant dense<0.000000e+00> : vector<8x128xf32>
    %2 = tpu.matmul %1, %0, %cst {dimension_numbers = #tpu.dot_dimension_numbers<[1], [0], [0], [1], [0, 0, 1, 1], [], []>} : vector<8x128xf32>, vector<128x128xf32>, vector<8x128xf32> -> vector<8x128xf32>
    %c0_3 = arith.constant 0 : index
    %c0_4 = arith.constant 0 : index
    %3 = vector.load %arg3[%c0_3, %c0_4] : memref<1x128xf32, #tpu.memory_space<vmem>>, vector<1x128xf32>
    %4 = vector.broadcast %3 : vector<1x128xf32> to vector<8x128xf32>
    %5 = arith.addf %2, %4 : vector<8x128xf32>
    %cst_5 = arith.constant 5.000000e-01 : f32
    %6 = vector.broadcast %cst_5 : f32 to vector<8x128xf32>
    %7 = arith.mulf %6, %5 : vector<8x128xf32>
    %8 = math.tanh %7 : vector<8x128xf32>
    %cst_6 = arith.constant 5.000000e-01 : f32
    %9 = vector.broadcast %cst_6 : f32 to vector<8x128xf32>
    %10 = arith.mulf %9, %8 : vector<8x128xf32>
    %cst_7 = arith.constant 5.000000e-01 : f32
    %11 = vector.broadcast %cst_7 : f32 to vector<8x128xf32>
    %12 = arith.addf %10, %11 : vector<8x128xf32>
    %cst_8 = arith.constant dense<0.000000e+00> : vector<8x128xf32>
    %13 = tpu.matmul %12, %0, %cst_8 {dimension_numbers = #tpu.dot_dimension_numbers<[1], [1], [0], [0], [0, 0, 1, 0], [], []>} : vector<8x128xf32>, vector<128x128xf32>, vector<8x128xf32> -> vector<8x128xf32>
    %c0_9 = arith.constant 0 : index
    %c0_10 = arith.constant 0 : index
    %14 = vector.load %arg4[%c0_9, %c0_10] : memref<1x128xf32, #tpu.memory_space<vmem>>, vector<1x128xf32>
    %15 = vector.broadcast %14 : vector<1x128xf32> to vector<8x128xf32>
    %16 = arith.addf %13, %15 : vector<8x128xf32>
    %cst_11 = arith.constant 5.000000e-01 : f32
    %17 = vector.broadcast %cst_11 : f32 to vector<8x128xf32>
    %18 = arith.mulf %17, %16 : vector<8x128xf32>
    %19 = math.tanh %18 : vector<8x128xf32>
    %cst_12 = arith.constant 5.000000e-01 : f32
    %20 = vector.broadcast %cst_12 : f32 to vector<8x128xf32>
    %21 = arith.mulf %20, %19 : vector<8x128xf32>
    %cst_13 = arith.constant 5.000000e-01 : f32
    %22 = vector.broadcast %cst_13 : f32 to vector<8x128xf32>
    %23 = arith.addf %21, %22 : vector<8x128xf32>
    %c0_14 = arith.constant 0 : index
    %c0_15 = arith.constant 0 : index
    %24 = vector.load %arg5[%c0_14, %c0_15] : memref<8x128xf32, #tpu.memory_space<vmem>>, vector<8x128xf32>
    tpu.vector_store %arg5[%c0_14, %c0_15], %23 {strides = array<i32>} : memref<8x128xf32, #tpu.memory_space<vmem>>, vector<8x128xf32>,
    return
  }
  func.func @transform_0(%arg0: i32) -> (i32, i32) {
    %c0_i32 = arith.constant 0 : i32
    %c0_i32_0 = arith.constant 0 : i32
    return %arg0, %c0_i32 : i32, i32
  }
  func.func @transform_1(%arg0: i32) -> (i32, i32) {
    %c0_i32 = arith.constant 0 : i32
    %c0_i32_0 = arith.constant 0 : i32
    %c0_i32_1 = arith.constant 0 : i32
    return %c0_i32, %c0_i32_0 : i32, i32
  }
  func.func @transform_2(%arg0: i32) -> (i32, i32) {
    %c0_i32 = arith.constant 0 : i32
    %c0_i32_0 = arith.constant 0 : i32
    %c0_i32_1 = arith.constant 0 : i32
    return %c0_i32, %c0_i32_0 : i32, i32
  }
  func.func @transform_3(%arg0: i32) -> (i32, i32) {
    %c0_i32 = arith.constant 0 : i32
    %c0_i32_0 = arith.constant 0 : i32
    %c0_i32_1 = arith.constant 0 : i32
    return %c0_i32, %c0_i32_0 : i32, i32
  }
  func.func @transform_4(%arg0: i32) -> (i32, i32) {
    %c0_i32 = arith.constant 0 : i32
    %c0_i32_0 = arith.constant 0 : i32
    return %arg0, %c0_i32 : i32, i32
  }
}

</mosaic_0001>

<bundles_post_ra>
// kernel: tpu_custom_call.1
= control target key start
LH: loop header
LB: loop body
LE: loop exit
PB: predicated region body
PF: predicated region fallthrough
CT: control target
= control target key end

     0   :  { %9 = vsyncpa [#allocation3], 0  ;;  %s504_s0 = inlined_call_operand.hbm [shape: f32[8,128], index: 0, kind: input, shape index: {}]   ;;  %s505_s1 = inlined_call_operand.hbm [shape: f32[128,128], index: 1, kind: input, shape index: {}]   ;;  %s506_s2 = inlined_call_operand.vmem [shape: f32[1,128], index: 2, kind: input, shape index: {}]   ;;  %s507_s3 = inlined_call_operand.vmem [shape: f32[1,128], index: 3, kind: input, shape index: {}]   ;;  %s508_s4 = inlined_call_operand.hbm [shape: f32[8,128], index: 4, kind: output, shape index: {}]  }
   0x1   :  { %10 = vsyncpa [#allocation6], 0 }
   0x2   :  { %11 = vsyncpa [#allocation4], 0  ;;  %s423_s15 = smov [#allocation2]   ;;  %s424_s17 = smov [#allocation5]  }
   0x3   :  { %s18_s16 = sshll.u32 %s423_s15, 4  ;;  %s27_s18 = sshll.u32 %s424_s17, 4  ;;  %s19_s16 = int_to_ptr.vmem [resolvable:$true] %s18_s16  ;;  %s28_s18 = int_to_ptr.vmem [resolvable:$true] %s27_s18 }
   0x4   :  { %s365_s19 = scalar_lea.vmem %s19_s16, 128  ;;  %p370_p1 = scmp.lt.s32.totalorder %s19_s16, %s19_s16 }
   0x5   :  { %p366_p0 = scmp.ne.s32.totalorder %s19_s16, %s365_s19  ;;  %p371_p2 = scmp.lt.s32.totalorder %s365_s19, %s365_s19 }
   0x7   :  { %p372_p3 = por %p371_p2, %p370_p1 }
   0x9   :  { %p373_p4 = pnand %p372_p3, %p366_p0 }
   0xb   :  { %376 = shalt.err (!%p373_p4)
}
   0xc   :  { %21 = dma.hbm_to_vmem [thread:$0]  %s504_s0, 128, %s19_s16, [#allocation3]  }
   0xd   :  { %s385_s22 = scalar_lea.vmem %s28_s18, 2048  ;;  %p390_p6 = scmp.lt.s32.totalorder %s28_s18, %s28_s18 }
   0xe   :  { %p386_p5 = scmp.ne.s32.totalorder %s28_s18, %s385_s22  ;;  %p391_p7 = scmp.lt.s32.totalorder %s385_s22, %s385_s22 }
  0x10   :  { %p392_p8 = por %p391_p7, %p390_p6 }
  0x12   :  { %p393_p9 = pnand %p392_p8, %p386_p5 }
  0x14   :  { %396 = shalt.err (!%p393_p9)
}
  0x15   :  { %s425_s23 = smov 128   ;;  %s426_s24 = smov 8  }
  0x16   :  { %33 = dma.hbm_to_vmem [thread:$0]  %s505_s1, 2048, %s28_s18, [#allocation6], %s425_s23, %s425_s23, %s426_s24  }
  0x17   :  { %417 = dma.done.wait [#allocation3], 128  }
  0x18   :  { %418 = vsyncadd [#allocation3], 4294967168 }
  0x19   :  { %419 = dma.done.wait [#allocation6], 2048  }
  0x1a   :  { %420 = vsyncadd [#allocation6], 4294965248  ;;  %v427_v0 = vmov 0.0   ;;  %vm428_vm0 = vmmov 0   ;;  %v59_v1 = vld [vmem:[#allocation5 + $0x78] sm:$0xff]  ;;  %v58_v2 = vld [vmem:[#allocation5 + $0x70] sm:$0xff] }
  0x1b   :  { %276 = vmatprep.subr.mxu0 %v427_v0  ;;  %308 = vmatprep.mubr.msk.f32.mxu0 %vm428_vm0, %v427_v0  ;;  %v57_v3 = vld [vmem:[#allocation5 + $0x68] sm:$0xff]  ;;  %v56_v4 = vld [vmem:[#allocation5 + $0x60] sm:$0xff]  ;;  %v55_v5 = vld [vmem:[#allocation5 + $0x58] sm:$0xff] }
  0x1c   :  { %311 = vmatprep.subr.mxu1 %v427_v0  ;;  %343 = vmatprep.mubr.msk.f32.mxu1 %vm428_vm0, %v427_v0  ;;  %v54_v6 = vld [vmem:[#allocation5 + $0x50] sm:$0xff]  ;;  %v53_v7 = vld [vmem:[#allocation5 + $0x48] sm:$0xff]  ;;  %v52_v8 = vld [vmem:[#allocation5 + $0x40] sm:$0xff] }
  0x1d   :  { %277 = vmatpush3.msra.mxu0 %v59_v1  ;;  %312 = vmatpush3.xpose.msra.mxu1 %v59_v1  ;;  %v51_v9 = vld [vmem:[#allocation5 + $0x38] sm:$0xff]  ;;  %v50_v10 = vld [vmem:[#allocation5 + $0x30] sm:$0xff]  ;;  %v49_v11 = vld [vmem:[#allocation5 + $0x28] sm:$0xff] }
  0x1e   :  { %278 = vmatprep.subr.mxu0 %v427_v0  ;;  %313 = vmatprep.subr.mxu1 %v427_v0  ;;  %v48_v12 = vld [vmem:[#allocation5 + $0x20] sm:$0xff]  ;;  %v47_v13 = vld [vmem:[#allocation5 + $0x18] sm:$0xff]  ;;  %v46_v14 = vld [vmem:[#allocation5 + $0x10] sm:$0xff] }
  0x1f   :  { %279 = vmatpush3.msra.mxu0 %v58_v2  ;;  %v45_v15 = vld [vmem:[#allocation5 + $0x8] sm:$0xff]  ;;  %v44_v16 = vld [vmem:[#allocation5] sm:$0xff]  ;;  %v60_v17 = vld [vmem:[#allocation2] sm:$0xff] }
  0x20   :  { %280 = vmatprep.subr.mxu0 %v427_v0  ;;  %v240_v18 = vld [vmem:[%s506_s2] ss:$0 sm:$0xff]  ;;  %s429_s2 = smov [#allocation7]  }
  0x21   :  { %281 = vmatpush3.msra.mxu0 %v57_v3  ;;  %314 = vmatpush3.xpose.msra.mxu1 %v58_v2  ;;  %v241_v26 = vld [vmem:[%s507_s3] ss:$0 sm:$0xff]  ;;  %s230_s29 = sshll.u32 %s429_s2, 4  ;;  %s231_s29 = int_to_ptr.vmem [resolvable:$true] %s230_s29 }
  0x22   :  { %282 = vmatprep.subr.mxu0 %v427_v0  ;;  %315 = vmatprep.subr.mxu1 %v427_v0  ;;  %s397_s30 = scalar_lea.vmem %s231_s29, 128  ;;  %p402_p11 = scmp.lt.s32.totalorder %s231_s29, %s231_s29 }
  0x23   :  { %283 = vmatpush3.msra.mxu0 %v56_v4  ;;  %p398_p10 = scmp.ne.s32.totalorder %s231_s29, %s397_s30  ;;  %p403_p12 = scmp.lt.s32.totalorder %s397_s30, %s397_s30 }
  0x24   :  { %284 = vmatprep.subr.mxu0 %v427_v0 }
  0x25   :  { %285 = vmatpush3.msra.mxu0 %v55_v5  ;;  %316 = vmatpush3.xpose.msra.mxu1 %v57_v3  ;;  %p404_p13 = por %p403_p12, %p402_p11 }
  0x26   :  { %286 = vmatprep.subr.mxu0 %v427_v0  ;;  %317 = vmatprep.subr.mxu1 %v427_v0 }
  0x27   :  { %287 = vmatpush3.msra.mxu0 %v54_v6  ;;  %p405_p0 = pnand %p404_p13, %p398_p10 }
  0x28   :  { %288 = vmatprep.subr.mxu0 %v427_v0 }
  0x29   :  { %289 = vmatpush3.msra.mxu0 %v53_v7  ;;  %318 = vmatpush3.xpose.msra.mxu1 %v56_v4 }
  0x2a   :  { %290 = vmatprep.subr.mxu0 %v427_v0  ;;  %319 = vmatprep.subr.mxu1 %v427_v0 }
  0x2b   :  { %291 = vmatpush3.msra.mxu0 %v52_v8 }
  0x2c   :  { %292 = vmatprep.subr.mxu0 %v427_v0 }
  0x2d   :  { %293 = vmatpush3.msra.mxu0 %v51_v9  ;;  %320 = vmatpush3.xpose.msra.mxu1 %v55_v5 }
  0x2e   :  { %294 = vmatprep.subr.mxu0 %v427_v0  ;;  %321 = vmatprep.subr.mxu1 %v427_v0 }
  0x2f   :  { %295 = vmatpush3.msra.mxu0 %v50_v10 }
  0x30   :  { %296 = vmatprep.subr.mxu0 %v427_v0 }
  0x31   :  { %297 = vmatpush3.msra.mxu0 %v49_v11  ;;  %322 = vmatpush3.xpose.msra.mxu1 %v54_v6 }
  0x32   :  { %298 = vmatprep.subr.mxu0 %v427_v0  ;;  %323 = vmatprep.subr.mxu1 %v427_v0 }
  0x33   :  { %299 = vmatpush3.msra.mxu0 %v48_v12 }
  0x34   :  { %300 = vmatprep.subr.mxu0 %v427_v0 }
  0x35   :  { %301 = vmatpush3.msra.mxu0 %v47_v13  ;;  %324 = vmatpush3.xpose.msra.mxu1 %v53_v7 }
  0x36   :  { %302 = vmatprep.subr.mxu0 %v427_v0  ;;  %325 = vmatprep.subr.mxu1 %v427_v0 }
  0x37   :  { %303 = vmatpush3.msra.mxu0 %v46_v14 }
  0x38   :  { %304 = vmatprep.subr.mxu0 %v427_v0 }
  0x39   :  { %305 = vmatpush3.msra.mxu0 %v45_v15  ;;  %326 = vmatpush3.xpose.msra.mxu1 %v52_v8 }
  0x3a   :  { %306 = vmatprep.subr.mxu0 %v427_v0  ;;  %327 = vmatprep.subr.mxu1 %v427_v0 }
  0x3b   :  { %307 = vmatpush3.msra.mxu0 %v44_v16 }
  0x3c   :  { %309 = vmatmul.mubr.f32.vlgmr.msra.gmra.mxu0 %v60_v17 }
  0x3d   :  { %328 = vmatpush3.xpose.msra.mxu1 %v51_v9 }
  0x3e   :  { %329 = vmatprep.subr.mxu1 %v427_v0 }
  0x41   :  { %330 = vmatpush3.xpose.msra.mxu1 %v50_v10 }
  0x42   :  { %331 = vmatprep.subr.mxu1 %v427_v0 }
  0x45   :  { %332 = vmatpush3.xpose.msra.mxu1 %v49_v11 }
  0x46   :  { %333 = vmatprep.subr.mxu1 %v427_v0 }
  0x49   :  { %334 = vmatpush3.xpose.msra.mxu1 %v48_v12 }
  0x4a   :  { %335 = vmatprep.subr.mxu1 %v427_v0 }
  0x4d   :  { %336 = vmatpush3.xpose.msra.mxu1 %v47_v13 }
  0x4e   :  { %337 = vmatprep.subr.mxu1 %v427_v0 }
  0x51   :  { %338 = vmatpush3.xpose.msra.mxu1 %v46_v14 }
  0x52   :  { %339 = vmatprep.subr.mxu1 %v427_v0 }
  0x55   :  { %340 = vmatpush3.xpose.msra.mxu1 %v45_v15 }
  0x56   :  { %341 = vmatprep.subr.mxu1 %v427_v0 }
  0x59   :  { %342 = vmatpush3.xpose.msra.mxu1 %v44_v16 }
  0xfc   :  { %v134_v19 = vpop.f32.mrf.mxu0 }
  0xfd   :  { %v135_v20 = vadd.f32 %v240_v18, %v134_v19 }
  0xfe   :  { %v310_v21 = vpop.f32.mrf.mxu0 }
  0xff   :  { %v138_v22 = vmul.f32 0.5, %v135_v20 }
 0x101   :  { %353 = vtanh.f32 %v138_v22 }
 0x10e   :  { %v354_v23 = vpop.eup %353 }
 0x10f   :  { %v140_v24 = vmul.f32 0.5, %v354_v23 }
 0x111   :  { %v141_v25 = vadd.f32 0.5, %v140_v24 }
 0x113   :  { %344 = vmatmul.mubr.f32.vlgmr.msra.gmra.mxu1 %v141_v25 }
 0x1d3   :  { %v215_v27 = vpop.f32.mrf.mxu1 }
 0x1d4   :  { %v216_v28 = vadd.f32 %v241_v26, %v215_v27 }
 0x1d5   :  { %v345_v29 = vpop.f32.mrf.mxu1 }
 0x1d6   :  { %v219_v30 = vmul.f32 0.5, %v216_v28 }
 0x1d8   :  { %355 = vtanh.f32 %v219_v30 }
 0x1e5   :  { %v356_v31 = vpop.eup %355 }
 0x1e6   :  { %v221_v32 = vmul.f32 0.5, %v356_v31 }
 0x1e8   :  { %v222_v33 = vadd.f32 0.5, %v221_v32 }
 0x1ea   :  { %223 = vst [vmem:[#allocation7] sm:$0xff] %v222_v33 }
 0x1eb   :  { %408 = shalt.err (!%p405_p0)
}
 0x1ec   :  { %233 = dma.vmem_to_hbm [thread:$0]  %s231_s29, 128, %s508_s4, [#allocation4]  }
 0x1ed   :  { %421 = dma.done.wait [#allocation4], 128  }
 0x1ee   :  { %422 = vsyncadd [#allocation4], 4294967168 }
 0x1ef   :  { %237 = vsyncpa [#allocation3], 1 }
 0x1f0   :  { %238 = vsyncpa [#allocation6], 1 }
 0x1f1   :  { %239 = vsyncpa [#allocation4], 1 }

</bundles_post_ra>
